<compile_context>
chip_gen: v6e
topology: v6e:2x2x1
jax: 0.10.0
libtpu: 0.0.40
codegen_flags: <defaults>
</compile_context>

<pallas_src>
import jax
import jax.numpy as jnp
from jax.experimental import pallas as pl
from jax.experimental.pallas import tpu as pltpu


# ----------------------------- configuration --------------------------------
D_MODEL = 32
BATCH = 2
T_ENC = 8                  # encoder_output_* time length (unused by identity)
T_FUT = 6                  # x_future time length


# ------------------------------- kernel -------------------------------------
def _identity_kernel(x_ref, o_ref, copy_sem):
    """Identity: one direct HBM->HBM DMA, no VMEM staging, no VPU work."""
    cp = pltpu.make_async_copy(x_ref, o_ref, copy_sem)
    cp.start()
    cp.wait()


# ------------------------------- wrapper -------------------------------------
def identity_decoder_forward(x_future, encoder_output_layer, encoder_output_net,
                             hx1, hx2):
    """Matches ForecastingDecoderLayer.forward signature; returns x_future.

    Only x_future is routed through the Pallas kernel — the other arguments are
    part of the abstract interface and are ignored by this decoder variant.
    """
    del encoder_output_layer, encoder_output_net, hx1, hx2  # unused by Identity

    bytes_accessed = 2 * x_future.size * x_future.dtype.itemsize  # read + write
    return pl.pallas_call(
        _identity_kernel,
        out_shape=jax.ShapeDtypeStruct(x_future.shape, x_future.dtype),
        # Leave both operands in HBM; the kernel moves bytes with a single DMA.
        in_specs=[pl.BlockSpec(memory_space=pl.ANY)],
        out_specs=pl.BlockSpec(memory_space=pl.ANY),
        scratch_shapes=[pltpu.SemaphoreType.DMA(())],
        # Zero-FLOP copy: let XLA schedule/overlap it freely.
        cost_estimate=pl.CostEstimate(
            flops=0, transcendentals=0, bytes_accessed=bytes_accessed),
    )(x_future)


# --------------------------------- main --------------------------------------
if __name__ == "__main__":
    key = jax.random.PRNGKey(0)
    k1, k2, k3, k4, k5 = jax.random.split(key, 5)

    # Inputs consistent with the forecasting-decoder interface.
    x_future = jax.random.normal(k1, (BATCH, T_FUT, D_MODEL), jnp.float32)
    encoder_output_layer = jax.random.normal(k2, (BATCH, T_ENC, D_MODEL),
                                             jnp.float32)
    encoder_output_net = jax.random.normal(k3, (BATCH, T_ENC, D_MODEL),
                                           jnp.float32)
    hx1 = jax.random.normal(k4, (BATCH, D_MODEL), jnp.float32)
    hx2 = jax.random.normal(k5, (BATCH, D_MODEL), jnp.float32)

    out = identity_decoder_forward(x_future, encoder_output_layer,
                                   encoder_output_net, hx1, hx2)
    out = jax.block_until_ready(out)

    # Reference: identity on x_future (input is not donated, so it is live).
    assert out.shape == x_future.shape
    assert out.dtype == x_future.dtype
    assert jnp.array_equal(out, x_future), "identity mismatch"

    print("KERNEL_OK")
</pallas_src>

<mosaic_0001>
module attributes {stable_mosaic.version = 11 : i64} {
  func.func @_identity_kernel(%arg0: memref<2x6x32xf32, #tpu.memory_space<any>>, %arg1: memref<2x6x32xf32, #tpu.memory_space<any>>, %arg2: memref<!tpu.dma_semaphore, #tpu.memory_space<semaphore_mem>>) attributes {dimension_semantics = [], scalar_prefetch = 0 : i64, scratch_operands = 1 : i64, tpu.core_type = #tpu.core_type<tc>} {
    tpu.enqueue_dma source(%arg0 : memref<2x6x32xf32, #tpu.memory_space<any>>) target(%arg1 : memref<2x6x32xf32, #tpu.memory_space<any>>) target_semaphore(%arg2 : memref<!tpu.dma_semaphore, #tpu.memory_space<semaphore_mem>>)
    tpu.wait_dma2 semaphore(%arg2 : memref<!tpu.dma_semaphore, #tpu.memory_space<semaphore_mem>>) src(%arg0 : memref<2x6x32xf32, #tpu.memory_space<any>>) dst(%arg1 : memref<2x6x32xf32, #tpu.memory_space<any>>)
    return
  }
}

</mosaic_0001>

<bundles_post_ra>
// kernel: tpu_custom_call.1
= control target key start
LH: loop header
LB: loop body
LE: loop exit
PB: predicated region body
PF: predicated region fallthrough
CT: control target
= control target key end

     0   :  { %s113_s0 = inlined_call_operand.vmem [shape: f32[2,6,32], index: 0, kind: input, shape index: {}]   ;;  %s114_s1 = inlined_call_operand.vmem [shape: f32[2,6,32], index: 1, kind: output, shape index: {}]  }
   0x1   :  { %v24_v0 = vld [vmem:[%s113_s0] sm:$0x3f]  ;;  %v26_v1 = vld [vmem:[%s113_s0 + $0x8] sm:$0x3f] }
   0x2   :  { %25 = vst [vmem:[%s114_s1] sm:$0x3f] %v24_v0  ;;  %27 = vst [vmem:[%s114_s1 + $0x8] sm:$0x3f] %v26_v1 }
   0x3   :  { %63 = vsyncadd [#allocation2], 192 }
   0x4   :  { %89 = dma.done.wait [#allocation2], 192 }
   0x5   :  { %90 = vsyncadd [#allocation2], 4294967104 }
   0x6   :  { %68 = vsyncmov [#allocation2] }
   0x9   :  { %s69_s14 = vpop.sfrf %68 }
   0xa   :  { %p88_p0 = scmp.ne.s32.totalorder %s69_s14, 0 }
   0xc   :  { %73 = shalt.err (%p88_p0)  }

</bundles_post_ra>
